<compile_context>
chip_gen: v7x
topology: tpu7x:2x2x1
jax: 0.10.0
libtpu: 0.0.40
codegen_flags: <defaults>
</compile_context>

<pallas_src>
import functools

import numpy as np
import jax
import jax.numpy as jnp
from jax.experimental import pallas as pl
from jax.experimental.pallas import tpu as pltpu


_PARALLEL_1D = pltpu.CompilerParams(dimension_semantics=("parallel",))


# ----------------------------------------------------------------------------
# FFT_for_Period — host-side glue (torch code also moves the indices to CPU).
# ----------------------------------------------------------------------------
def fft_for_period(x, k=2):
    x_np = np.asarray(jax.device_get(x))
    xf = np.fft.rfft(x_np, axis=1)                       # (B, T//2+1, N) complex
    amp = np.abs(xf)
    freq = amp.mean(axis=0).mean(axis=-1)                # (T//2+1,)
    freq[0] = 0.0
    top = np.argsort(freq)[::-1][:k]                     # top-k indices (descending)
    periods = (x_np.shape[1] // top).astype(np.int64)    # (k,)
    period_weight = amp.mean(axis=-1)[:, top]            # (B, k)
    return periods, jnp.asarray(period_weight, dtype=jnp.float32)


# ----------------------------------------------------------------------------
# Kernel A: 1x1-conv channel mix producing Q, K, V.  x: (N, L) per batch.
# ----------------------------------------------------------------------------
def _pa_qkv_kernel(x_ref, wq_ref, wk_ref, wv_ref, q_ref, k_ref, v_ref):
    x = x_ref[...]                                              # (N, L)
    q_ref[...] = jnp.dot(wq_ref[...], x,
                         preferred_element_type=jnp.float32).astype(q_ref.dtype)
    k_ref[...] = jnp.dot(wk_ref[...], x,
                         preferred_element_type=jnp.float32).astype(k_ref.dtype)
    v_ref[...] = jnp.dot(wv_ref[...], x,
                         preferred_element_type=jnp.float32).astype(v_ref.dtype)


def pa_qkv(x_nl, wq, wk, wv):
    B, N, L = x_nl.shape
    sds = jax.ShapeDtypeStruct((B, N, L), x_nl.dtype)
    act_spec = pl.BlockSpec((None, N, L), lambda b: (b, 0, 0))
    w_spec = pl.BlockSpec((N, N), lambda b: (0, 0))
    return pl.pallas_call(
        _pa_qkv_kernel,
        grid=(B,),
        in_specs=[act_spec, w_spec, w_spec, w_spec],
        out_specs=[act_spec, act_spec, act_spec],
        out_shape=[sds, sds, sds],
        compiler_params=_PARALLEL_1D,
    )(x_nl, wq, wk, wv)


# ----------------------------------------------------------------------------
# Kernel B: per-(batch, node) period attention over a (P, F) tile.
# ----------------------------------------------------------------------------
def _pa_attn_kernel(q_ref, k_ref, v_ref, o_ref, *, scale):
    q = q_ref[...].astype(jnp.float32)                          # (P, F)
    k = k_ref[...].astype(jnp.float32)
    v = v_ref[...].astype(jnp.float32)
    # q @ k^T via contraction on the last dim of both (no materialized transpose)
    s = jax.lax.dot_general(q, k, (((1,), (1,)), ((), ())),
                            preferred_element_type=jnp.float32) * scale   # (P, P)
    s = s - jnp.max(s, axis=-1, keepdims=True)
    e = jnp.exp(s)
    p = e / jnp.sum(e, axis=-1, keepdims=True)
    o_ref[...] = jnp.dot(p, v, preferred_element_type=jnp.float32).astype(o_ref.dtype)


def pa_attn(q, k, v, scale):
    R, P, F_ = q.shape                                          # R = B * N
    spec = pl.BlockSpec((None, P, F_), lambda r: (r, 0, 0))
    kern = functools.partial(_pa_attn_kernel, scale=scale)
    return pl.pallas_call(
        kern,
        grid=(R,),
        in_specs=[spec, spec, spec],
        out_specs=spec,
        out_shape=jax.ShapeDtypeStruct((R, P, F_), q.dtype),
        compiler_params=_PARALLEL_1D,
    )(q, k, v)


# ----------------------------------------------------------------------------
# Kernel C: channel projection  Y = W @ X + b   (Linear over the node axis).
# ----------------------------------------------------------------------------
def _chan_proj_kernel(x_ref, w_ref, b_ref, o_ref):
    y = jnp.dot(w_ref[...], x_ref[...], preferred_element_type=jnp.float32)
    o_ref[...] = (y + b_ref[...]).astype(o_ref.dtype)           # b: (N, 1) broadcast


def chan_proj(x_nl, w, b):
    B, N, L = x_nl.shape
    b2 = jnp.asarray(b).reshape(N, 1)
    act_spec = pl.BlockSpec((None, N, L), lambda i: (i, 0, 0))
    return pl.pallas_call(
        _chan_proj_kernel,
        grid=(B,),
        in_specs=[act_spec,
                  pl.BlockSpec((N, N), lambda i: (0, 0)),
                  pl.BlockSpec((N, 1), lambda i: (0, 0))],
        out_specs=act_spec,
        out_shape=jax.ShapeDtypeStruct((B, N, L), x_nl.dtype),
        compiler_params=_PARALLEL_1D,
    )(x_nl, w, b2)


# ----------------------------------------------------------------------------
# Kernel D: SpatialAttention fully fused per batch element; works in (N, T).
# ----------------------------------------------------------------------------
def _sa_kernel(x_ref, wq_ref, wk_ref, wv_ref, wp_ref, bp_ref, o_ref, *, scale):
    x = x_ref[...].astype(jnp.float32)                          # (N, T)
    q = jnp.dot(wq_ref[...], x, preferred_element_type=jnp.float32)
    k = jnp.dot(wk_ref[...], x, preferred_element_type=jnp.float32)
    v = jnp.dot(wv_ref[...], x, preferred_element_type=jnp.float32)
    s = jax.lax.dot_general(q, k, (((1,), (1,)), ((), ())),
                            preferred_element_type=jnp.float32) * scale   # (N, N)
    s = s - jnp.max(s, axis=-1, keepdims=True)
    e = jnp.exp(s)
    p = e / jnp.sum(e, axis=-1, keepdims=True)
    o = jnp.dot(p, v, preferred_element_type=jnp.float32)                 # (N, T)
    y = jnp.dot(wp_ref[...], o, preferred_element_type=jnp.float32) + bp_ref[...]
    o_ref[...] = y.astype(o_ref.dtype)


def spatial_attention(x_nt, sp):
    B, N, T = x_nt.shape
    bp2 = jnp.asarray(sp["bp"]).reshape(N, 1)
    act_spec = pl.BlockSpec((None, N, T), lambda i: (i, 0, 0))
    w_spec = pl.BlockSpec((N, N), lambda i: (0, 0))
    kern = functools.partial(_sa_kernel, scale=float(N) ** -0.5)
    return pl.pallas_call(
        kern,
        grid=(B,),
        in_specs=[act_spec, w_spec, w_spec, w_spec, w_spec,
                  pl.BlockSpec((N, 1), lambda i: (0, 0))],
        out_specs=act_spec,
        out_shape=jax.ShapeDtypeStruct((B, N, T), x_nt.dtype),
        compiler_params=_PARALLEL_1D,
    )(x_nt, sp["wq"], sp["wk"], sp["wv"], sp["wp"], bp2)


# ----------------------------------------------------------------------------
# Kernel E: period-weighted combine + residual.  Mixing weights live in SMEM.
# ----------------------------------------------------------------------------
def _combine_kernel(w_ref, res_ref, x_ref, o_ref, *, num_branches):
    b = pl.program_id(0)
    acc = x_ref[...].astype(jnp.float32)                        # (N, T) residual
    for i in range(num_branches):                               # small, unrolled
        acc = acc + res_ref[i].astype(jnp.float32) * w_ref[b, i]
    o_ref[...] = acc.astype(o_ref.dtype)


def combine(pw, res_stack, x_nt):
    K, B, N, T = res_stack.shape
    kern = functools.partial(_combine_kernel, num_branches=K)
    # NOTE: input_output_aliases={2: 0} could alias x_nt to the output if the
    # caller accepts in-place semantics; omitted here for clarity.
    return pl.pallas_call(
        kern,
        grid=(B,),
        in_specs=[
            pl.BlockSpec(memory_space=pltpu.MemorySpace.SMEM),   # (B, K) weights
            pl.BlockSpec((K, None, N, T), lambda b: (0, b, 0, 0)),
            pl.BlockSpec((None, N, T), lambda b: (b, 0, 0)),
        ],
        out_specs=pl.BlockSpec((None, N, T), lambda b: (b, 0, 0)),
        out_shape=jax.ShapeDtypeStruct((B, N, T), x_nt.dtype),
        compiler_params=_PARALLEL_1D,
    )(pw, res_stack, x_nt)


# ----------------------------------------------------------------------------
# Full PSBlock forward (Pallas path).
# ----------------------------------------------------------------------------
def psblock_forward(x, params, top_k=2):
    B, T, N = x.shape
    periods, period_weight = fft_for_period(x, top_k)
    res_nt = []
    for i in range(top_k):
        period = int(periods[i])
        if T % period != 0:
            length = (T // period + 1) * period
            xp = jnp.pad(x, ((0, 0), (0, length - T), (0, 0)))
        else:
            length = T
            xp = x
        P, F_ = length // period, period
        pp = params["period"][i]
        sp = params["spatial"][i]

        # (B, length, N) -> (B, N, L); flattened L index == p*F + f == time index
        x_nl = jnp.transpose(xp, (0, 2, 1))
        q, k_, v = pa_qkv(x_nl, pp["wq"], pp["wk"], pp["wv"])
        o = pa_attn(q.reshape(B * N, P, F_),
                    k_.reshape(B * N, P, F_),
                    v.reshape(B * N, P, F_),
                    float(F_) ** -0.5)
        y_nl = chan_proj(o.reshape(B, N, length), pp["wp"], pp["bp"])
        xs_nt = y_nl[:, :, :T]                                  # crop back to T
        res_nt.append(spatial_attention(xs_nt, sp))             # (B, N, T)

    res_stack = jnp.stack(res_nt, axis=0)                       # (k, B, N, T)
    pw = jax.nn.softmax(period_weight, axis=1)                  # (B, k)
    x_nt = jnp.transpose(x, (0, 2, 1))
    out_nt = combine(pw, res_stack, x_nt)                       # (B, N, T)
    return jnp.transpose(out_nt, (0, 2, 1))                     # (B, T, N)


# ----------------------------------------------------------------------------
# Pure-JAX reference (mirrors the PyTorch module op-by-op).
# ----------------------------------------------------------------------------
def _period_attention_ref(x_bnpf, p):
    F_ = x_bnpf.shape[-1]
    hp = jax.lax.Precision.HIGHEST
    q = jnp.einsum("om,bmpf->bopf", p["wq"], x_bnpf, precision=hp)
    k = jnp.einsum("om,bmpf->bopf", p["wk"], x_bnpf, precision=hp)
    v = jnp.einsum("om,bmpf->bopf", p["wv"], x_bnpf, precision=hp)
    attn = jnp.einsum("bnpf,bnqf->bnpq", q, k, precision=hp) * (float(F_) ** -0.5)
    attn = jax.nn.softmax(attn, axis=-1)
    px = jnp.einsum("bnpq,bnqf->bnpf", attn, v, precision=hp)
    px = jnp.transpose(px, (0, 3, 2, 1))                        # (B, F, P, N)
    y = jnp.einsum("bfpn,on->bfpo", px, p["wp"], precision=hp) + p["bp"]
    return jnp.transpose(y, (0, 3, 2, 1))                       # (B, N, P, F)


def _spatial_attention_ref(x_btn, p):
    N = x_btn.shape[-1]
    hp = jax.lax.Precision.HIGHEST
    xt = jnp.transpose(x_btn, (0, 2, 1))                        # (B, N, T)
    q = jnp.einsum("om,bmt->bot", p["wq"], xt, precision=hp)
    k = jnp.einsum("om,bmt->bot", p["wk"], xt, precision=hp)
    v = jnp.einsum("om,bmt->bot", p["wv"], xt, precision=hp)
    attn = jnp.einsum("bnt,bmt->bnm", q, k, precision=hp) * (float(N) ** -0.5)
    attn = jax.nn.softmax(attn, axis=-1)
    px = jnp.einsum("bnm,bmt->bnt", attn, v, precision=hp)
    px = jnp.transpose(px, (0, 2, 1))                           # (B, T, N)
    return jnp.einsum("btn,on->bto", px, p["wp"], precision=hp) + p["bp"]


def psblock_ref(x, params, top_k=2):
    B, T, N = x.shape
    periods, period_weight = fft_for_period(x, top_k)
    res = []
    for i in range(top_k):
        period = int(periods[i])
        if T % period != 0:
            length = (T // period + 1) * period
            out = jnp.pad(x, ((0, 0), (0, length - T), (0, 0)))
        else:
            length = T
            out = x
        out = out.reshape(B, length // period, period, N).transpose(0, 3, 1, 2)
        out = _period_attention_ref(out, params["period"][i])
        out = out.transpose(0, 2, 3, 1).reshape(B, -1, N)[:, :T, :]
        out = _spatial_attention_ref(out, params["spatial"][i])
        res.append(out)
    res = jnp.stack(res, axis=-1)                               # (B, T, N, k)
    pw = jax.nn.softmax(period_weight, axis=1)                  # (B, k)
    res = jnp.sum(res * pw[:, None, None, :], axis=-1)
    return res + x


# ----------------------------------------------------------------------------
# Deterministic parameter construction + test.
# ----------------------------------------------------------------------------
def init_params(key, num_nodes, top_k):
    def attn_params(k_):
        ks = jax.random.split(k_, 5)
        s = 1.0 / np.sqrt(num_nodes)
        return {
            "wq": jax.random.uniform(ks[0], (num_nodes, num_nodes), jnp.float32, -s, s),
            "wk": jax.random.uniform(ks[1], (num_nodes, num_nodes), jnp.float32, -s, s),
            "wv": jax.random.uniform(ks[2], (num_nodes, num_nodes), jnp.float32, -s, s),
            "wp": jax.random.uniform(ks[3], (num_nodes, num_nodes), jnp.float32, -s, s),
            "bp": jax.random.uniform(ks[4], (num_nodes,), jnp.float32, -s, s),
        }

    keys = jax.random.split(key, 2 * top_k)
    return {
        "period": [attn_params(keys[i]) for i in range(top_k)],
        "spatial": [attn_params(keys[top_k + i]) for i in range(top_k)],
    }


if __name__ == "__main__":
    key = jax.random.PRNGKey(0)
    k_x, k_p = jax.random.split(key)

    B, T, N = 2, 8, 16
    TOP_K = 2

    x = jax.random.normal(k_x, (B, T, N), dtype=jnp.float32)
    params = init_params(k_p, N, TOP_K)

    out = psblock_forward(x, params, TOP_K)
    out = jax.block_until_ready(out)

    ref = psblock_ref(x, params, TOP_K)
    np.testing.assert_allclose(np.asarray(out), np.asarray(ref), rtol=2e-3, atol=2e-3)

    print("KERNEL_OK")
</pallas_src>

<mosaic_0001>
module attributes {stable_mosaic.version = 11 : i64} {
  func.func @_pa_qkv_kernel(%arg0: i32, %arg1: memref<1x16x8xf32, #tpu.memory_space<vmem>>, %arg2: memref<16x16xf32, #tpu.memory_space<vmem>>, %arg3: memref<16x16xf32, #tpu.memory_space<vmem>>, %arg4: memref<16x16xf32, #tpu.memory_space<vmem>>, %arg5: memref<1x16x8xf32, #tpu.memory_space<vmem>>, %arg6: memref<1x16x8xf32, #tpu.memory_space<vmem>>, %arg7: memref<1x16x8xf32, #tpu.memory_space<vmem>>) attributes {dimension_semantics = [#tpu.dimension_semantics<parallel>], iteration_bounds = array<i64: 2>, scalar_prefetch = 0 : i64, scratch_operands = 0 : i64, tpu.core_type = #tpu.core_type<tc>, window_params = [{transform_indices = @transform_0, window_bounds = array<i64: 1, 16, 8>}, {pipeline_mode = #tpu.pipeline_mode<synchronous>, transform_indices = @transform_1, window_bounds = array<i64: 16, 16>}, {pipeline_mode = #tpu.pipeline_mode<synchronous>, transform_indices = @transform_2, window_bounds = array<i64: 16, 16>}, {pipeline_mode = #tpu.pipeline_mode<synchronous>, transform_indices = @transform_3, window_bounds = array<i64: 16, 16>}, {transform_indices = @transform_4, window_bounds = array<i64: 1, 16, 8>}, {transform_indices = @transform_5, window_bounds = array<i64: 1, 16, 8>}, {transform_indices = @transform_6, window_bounds = array<i64: 1, 16, 8>}]} {
    %c0 = arith.constant 0 : index
    %c0_0 = arith.constant 0 : index
    %c0_1 = arith.constant 0 : index
    %0 = vector.load %arg1[%c0, %c0_0, %c0_1] : memref<1x16x8xf32, #tpu.memory_space<vmem>>, vector<1x16x8xf32>
    %1 = vector.shape_cast %0 : vector<1x16x8xf32> to vector<16x8xf32>
    %c0_2 = arith.constant 0 : index
    %c0_3 = arith.constant 0 : index
    %2 = vector.load %arg2[%c0_2, %c0_3] : memref<16x16xf32, #tpu.memory_space<vmem>>, vector<16x16xf32>
    %cst = arith.constant dense<0.000000e+00> : vector<16x8xf32>
    %3 = tpu.matmul %2, %1, %cst {dimension_numbers = #tpu.dot_dimension_numbers<[1], [0], [0], [1], [0, 0, 1, 1], [], []>} : vector<16x16xf32>, vector<16x8xf32>, vector<16x8xf32> -> vector<16x8xf32>
    %c0_4 = arith.constant 0 : index
    %c0_5 = arith.constant 0 : index
    %c0_6 = arith.constant 0 : index
    %4 = vector.load %arg5[%c0_4, %c0_5, %c0_6] : memref<1x16x8xf32, #tpu.memory_space<vmem>>, vector<1x16x8xf32>
    %5 = vector.shape_cast %4 : vector<1x16x8xf32> to vector<16x8xf32>
    %6 = vector.shape_cast %3 : vector<16x8xf32> to vector<1x16x8xf32>
    tpu.vector_store %arg5[%c0_4, %c0_5, %c0_6], %6 {strides = array<i32>} : memref<1x16x8xf32, #tpu.memory_space<vmem>>, vector<1x16x8xf32>,
    %c0_7 = arith.constant 0 : index
    %c0_8 = arith.constant 0 : index
    %7 = vector.load %arg3[%c0_7, %c0_8] : memref<16x16xf32, #tpu.memory_space<vmem>>, vector<16x16xf32>
    %cst_9 = arith.constant dense<0.000000e+00> : vector<16x8xf32>
    %8 = tpu.matmul %7, %1, %cst_9 {dimension_numbers = #tpu.dot_dimension_numbers<[1], [0], [0], [1], [0, 0, 1, 1], [], []>} : vector<16x16xf32>, vector<16x8xf32>, vector<16x8xf32> -> vector<16x8xf32>
    %c0_10 = arith.constant 0 : index
    %c0_11 = arith.constant 0 : index
    %c0_12 = arith.constant 0 : index
    %9 = vector.load %arg6[%c0_10, %c0_11, %c0_12] : memref<1x16x8xf32, #tpu.memory_space<vmem>>, vector<1x16x8xf32>
    %10 = vector.shape_cast %9 : vector<1x16x8xf32> to vector<16x8xf32>
    %11 = vector.shape_cast %8 : vector<16x8xf32> to vector<1x16x8xf32>
    tpu.vector_store %arg6[%c0_10, %c0_11, %c0_12], %11 {strides = array<i32>} : memref<1x16x8xf32, #tpu.memory_space<vmem>>, vector<1x16x8xf32>,
    %c0_13 = arith.constant 0 : index
    %c0_14 = arith.constant 0 : index
    %12 = vector.load %arg4[%c0_13, %c0_14] : memref<16x16xf32, #tpu.memory_space<vmem>>, vector<16x16xf32>
    %cst_15 = arith.constant dense<0.000000e+00> : vector<16x8xf32>
    %13 = tpu.matmul %12, %1, %cst_15 {dimension_numbers = #tpu.dot_dimension_numbers<[1], [0], [0], [1], [0, 0, 1, 1], [], []>} : vector<16x16xf32>, vector<16x8xf32>, vector<16x8xf32> -> vector<16x8xf32>
    %c0_16 = arith.constant 0 : index
    %c0_17 = arith.constant 0 : index
    %c0_18 = arith.constant 0 : index
    %14 = vector.load %arg7[%c0_16, %c0_17, %c0_18] : memref<1x16x8xf32, #tpu.memory_space<vmem>>, vector<1x16x8xf32>
    %15 = vector.shape_cast %14 : vector<1x16x8xf32> to vector<16x8xf32>
    %16 = vector.shape_cast %13 : vector<16x8xf32> to vector<1x16x8xf32>
    tpu.vector_store %arg7[%c0_16, %c0_17, %c0_18], %16 {strides = array<i32>} : memref<1x16x8xf32, #tpu.memory_space<vmem>>, vector<1x16x8xf32>,
    return
  }
  func.func @transform_0(%arg0: i32) -> (i32, i32, i32) {
    %c0_i32 = arith.constant 0 : i32
    %c0_i32_0 = arith.constant 0 : i32
    %c0_i32_1 = arith.constant 0 : i32
    return %arg0, %c0_i32, %c0_i32_0 : i32, i32, i32
  }
  func.func @transform_1(%arg0: i32) -> (i32, i32) {
    %c0_i32 = arith.constant 0 : i32
    %c0_i32_0 = arith.constant 0 : i32
    %c0_i32_1 = arith.constant 0 : i32
    return %c0_i32, %c0_i32_0 : i32, i32
  }
  func.func @transform_2(%arg0: i32) -> (i32, i32) {
    %c0_i32 = arith.constant 0 : i32
    %c0_i32_0 = arith.constant 0 : i32
    %c0_i32_1 = arith.constant 0 : i32
    return %c0_i32, %c0_i32_0 : i32, i32
  }
  func.func @transform_3(%arg0: i32) -> (i32, i32) {
    %c0_i32 = arith.constant 0 : i32
    %c0_i32_0 = arith.constant 0 : i32
    %c0_i32_1 = arith.constant 0 : i32
    return %c0_i32, %c0_i32_0 : i32, i32
  }
  func.func @transform_4(%arg0: i32) -> (i32, i32, i32) {
    %c0_i32 = arith.constant 0 : i32
    %c0_i32_0 = arith.constant 0 : i32
    %c0_i32_1 = arith.constant 0 : i32
    return %arg0, %c0_i32, %c0_i32_0 : i32, i32, i32
  }
  func.func @transform_5(%arg0: i32) -> (i32, i32, i32) {
    %c0_i32 = arith.constant 0 : i32
    %c0_i32_0 = arith.constant 0 : i32
    %c0_i32_1 = arith.constant 0 : i32
    return %arg0, %c0_i32, %c0_i32_0 : i32, i32, i32
  }
  func.func @transform_6(%arg0: i32) -> (i32, i32, i32) {
    %c0_i32 = arith.constant 0 : i32
    %c0_i32_0 = arith.constant 0 : i32
    %c0_i32_1 = arith.constant 0 : i32
    return %arg0, %c0_i32, %c0_i32_0 : i32, i32, i32
  }
}

</mosaic_0001>

<bundles_post_ra>
// kernel: tpu_custom_call.1
= control target key start
LH: loop header
LB: loop body
LE: loop exit
PB: predicated region body
PF: predicated region fallthrough
CT: control target
= control target key end

     0   :  { %s778_s21 = smov 0   ;;  %s831_s0 = inlined_call_operand.vmem [shape: f32[2,16,8], index: 0, kind: input, shape index: {}]   ;;  %s832_s1 = inlined_call_operand.vmem [shape: f32[16,16], index: 1, kind: input, shape index: {}]   ;;  %s833_s2 = inlined_call_operand.vmem [shape: f32[16,16], index: 2, kind: input, shape index: {}]   ;;  %s834_s3 = inlined_call_operand.vmem [shape: f32[16,16], index: 3, kind: input, shape index: {}]   ;;  %s835_s4 = inlined_call_operand.vmem [shape: f32[2,16,8], index: 4, kind: output, shape index: {0}]   ;;  %s836_s5 = inlined_call_operand.vmem [shape: f32[2,16,8], index: 5, kind: output, shape index: {1}]   ;;  %s837_s6 = inlined_call_operand.vmem [shape: f32[2,16,8], index: 6, kind: output, shape index: {2}]  }
   0x1 LB: > { %s657_s22 = sadd.s32 4294967295, %s741_s21   ;;  %p661_p0 = scmp.ge.s32.totalorder %s741_s21, 1  ;;  %s741_s21 = sphi %s778_s21, %s17_s21  }
   0x2   : > { %p217_p1 = scmp.lt.s32.totalorder %s741_s21, 3 }
   0x4   : > { %p218_p2 = pnand %p661_p0, %p217_p1 }
   0x5   : > { %p257_p3 = scmp.lt.s32.totalorder (!%p218_p2), %s657_s22, 1  ;;  %v279_v0 = vld [vmem:[%s832_s1] sm:$0xff] (!%p218_p2)  ;;  %vm281_vm0 = vcmask (!%p218_p2), 130048   ;;  %v280_v5 = vld [vmem:[%s832_s1 + $0x8] sm:$0xff] (!%p218_p2)  ;;  %vm363_vm1 = vcmask (!%p218_p2), 64512  }
   0x6   : > { %221 = sbr.rel (%p218_p2) target bundleno = 241 (0xf1), region = 36  ;;  %v366_v1 = vld [vmem:[%s833_s2] sm:$0xff] (!%p218_p2)  ;;  %698 = vmatprep.mubr.msk.f32.mxu0 (!%p218_p2), %vm281_vm0, %v279_v0  ;;  %v367_v6 = vld [vmem:[%s833_s2 + $0x8] sm:$0xff] (!%p218_p2) }
   0x7   : > { %705 = vmatprep.mubr.msk.f32.mxu1 (!%p218_p2), %vm281_vm0, %v366_v1  ;;  %v451_v7 = vld [vmem:[%s834_s3] sm:$0xff] (!%p218_p2)  ;;  %v452_v8 = vld [vmem:[%s834_s3 + $0x8] sm:$0xff] (!%p218_p2) }
   0xd   : > { %s839_s22 = smov (!%p257_p3, %s657_s22), 1 }
   0xe   : > { %s794_s27 = sshll.u32 %s839_s22, 4 }
   0xf   : > { %s261_s30 = scalar_lea.vmem %s831_s0, %s794_s27  ;;  %s266_s17 = scalar_lea.vmem %s835_s4, %s794_s27 }
  0x10   : > { %v277_v2 = vld [vmem:[%s261_s30] sm:$0xff]  ;;  %v278_v3 = vld [vmem:[%s261_s30 + $0x8] sm:$0xff]  ;;  %s271_s20 = scalar_lea.vmem %s836_s5, %s794_s27  ;;  %s276_s24 = scalar_lea.vmem %s837_s6, %s794_s27 }
  0x11   : > { %v715_v4 = vpack.c.bf16 %v278_v3, %v277_v2 }
  0x13   : > { %716 = vmatprep.subr.bf16.mxu0 %v715_v4  ;;  %720 = vmatprep.subr.bf16.mxu1 %v715_v4 }
  0x14   : > { %718 = vmatpush3.bf16.msra.mxu0 %v715_v4  ;;  %722 = vmatpush3.bf16.msra.mxu1 %v715_v4 }
  0x15   : > { %724 = vmatprep.subr.bf16.mxu0 %v715_v4 }
  0x17   : > { %699 = vmatmul.mubr.msk.f32.vlgmr.msra.gmra.mrb[0].mxu0 %vm281_vm0, %v280_v5  ;;  %706 = vmatmul.mubr.msk.f32.vlgmr.msra.gmra.mrb[0].mxu1 %vm281_vm0, %v367_v6 }
  0x18   : > { %726 = vmatpush3.bf16.msra.mxu0 %v715_v4  ;;  %712 = vmatprep.mubr.msk.f32.mxu0 %vm281_vm0, %v451_v7 }
  0x1b   : > { %713 = vmatmul.mubr.msk.f32.vlgmr.msra.gmra.mrb[2].mxu0 %vm281_vm0, %v452_v8 }
  0xea   : > { %v700_v9 = vpop.f32.mrb[0].mxu0  ;;  %v707_v10 = vpop.f32.mrb[0].mxu1 }
  0xeb   : > { %365 = vst.msk [vmem:[%s266_s17 + $0x8] sm:$0xff] %vm363_vm1, %v700_v9  ;;  %v354_v11 = vpop.f32.mrb[1].mxu0  ;;  %450 = vst.msk [vmem:[%s271_s20 + $0x8] sm:$0xff] %vm363_vm1, %v707_v10  ;;  %v440_v12 = vpop.f32.mrb[1].mxu1 }
  0xec   : > { %364 = vst.msk [vmem:[%s266_s17] sm:$0xff] %vm363_vm1, %v354_v11  ;;  %449 = vst.msk [vmem:[%s271_s20] sm:$0xff] %vm363_vm1, %v440_v12 }
  0xee   : > { %v714_v13 = vpop.f32.mrb[2].mxu0 }
  0xef   : > { %535 = vst.msk [vmem:[%s276_s24 + $0x8] sm:$0xff] %vm363_vm1, %v714_v13  ;;  %v525_v14 = vpop.f32.mrb[3].mxu0 }
  0xf0   : > { %534 = vst.msk [vmem:[%s276_s24] sm:$0xff] %vm363_vm1, %v525_v14 }
  0xf1 PF: > { %s17_s21 = sadd.s32 1, %s741_s21  }
  0xf2   : > { %p14_p4 = scmp.ge.s32.totalorder %s17_s21, 4  }
  0xf4   :  { %16 = sbr.rel (!%p14_p4) target bundleno = 1 (0x1), region = 90 }

</bundles_post_ra>
